<compile_context>
chip_gen: v7x
topology: tpu7x:2x2x1
jax: 0.10.0
libtpu: 0.0.40
codegen_flags: <defaults>
</compile_context>

<pallas_src>
import functools
import math

import jax
import jax.numpy as jnp
from jax.experimental import pallas as pl
from jax.experimental.pallas import tpu as pltpu


def _pair(v):
    return (v, v) if isinstance(v, int) else tuple(v)


def _same_pads(dim2, dim3, kernel_size, stride):
    """Replicates the PyTorch module's padding arithmetic exactly."""
    kernel_size = _pair(kernel_size)
    stride = _pair(stride)
    in_width = dim2    # module's "in_width"  = input.size()[2]
    in_height = dim3   # module's "in_height" = input.size()[3]
    out_width = math.ceil(float(in_width) / float(stride[0]))
    out_height = math.ceil(float(in_height) / float(stride[1]))
    pad_along_width = (out_width - 1) * stride[0] + kernel_size[0] - in_width
    pad_along_height = (out_height - 1) * stride[1] + kernel_size[1] - in_height
    pad_left = math.floor(pad_along_width / 2)
    pad_top = math.floor(pad_along_height / 2)
    pad_right = pad_along_width - pad_left
    pad_bottom = pad_along_height - pad_top
    # F.pad: (pad_left, pad_right) -> last dim (dim 3); (pad_top, pad_bottom) -> dim 2.
    dim2_pads = (pad_top, pad_bottom)
    dim3_pads = (pad_left, pad_right)
    return dim2_pads, dim3_pads


def _same_pad_kernel(x_ref, o_ref, *, pad_top, pad_bottom, pad_left, pad_right):
    # x_ref: (c_block, H, W)   o_ref: (c_block, H_out, W_out)
    c_blk, h_out, w_out = o_ref.shape
    _, h_in, w_in = x_ref.shape
    dt = o_ref.dtype
    # Border strips: full-lane-width zero stores where possible (top/bottom rows
    # span the whole W_out).  All pad amounts are static Python ints.
    if pad_top:
        o_ref[:, 0:pad_top, :] = jnp.zeros((c_blk, pad_top, w_out), dt)
    if pad_bottom:
        o_ref[:, pad_top + h_in:h_out, :] = jnp.zeros((c_blk, pad_bottom, w_out), dt)
    if pad_left:
        o_ref[:, pad_top:pad_top + h_in, 0:pad_left] = jnp.zeros((c_blk, h_in, pad_left), dt)
    if pad_right:
        o_ref[:, pad_top:pad_top + h_in, pad_left + w_in:w_out] = jnp.zeros(
            (c_blk, h_in, pad_right), dt)
    # Interior: single bulk store of the whole input block.
    o_ref[:, pad_top:pad_top + h_in, pad_left:pad_left + w_in] = x_ref[...]


def same_pad_2d(x, kernel_size, stride):
    """JAX/Pallas equivalent of SamePad2d.forward (NCHW input)."""
    x = jnp.asarray(x)
    N, C, H, W = x.shape
    (p_top, p_bot), (p_left, p_right) = _same_pads(H, W, kernel_size, stride)

    # Negative pads crop (same behavior as F.pad with negative values) -- glue.
    c_top, c_bot = max(0, -p_top), max(0, -p_bot)
    c_left, c_right = max(0, -p_left), max(0, -p_right)
    if c_top or c_bot or c_left or c_right:
        x = x[:, :, c_top:H - c_bot, c_left:W - c_right]
    p_top, p_bot = max(0, p_top), max(0, p_bot)
    p_left, p_right = max(0, p_left), max(0, p_right)

    N, C, Hc, Wc = x.shape
    H_out = Hc + p_top + p_bot
    W_out = Wc + p_left + p_right

    # Channel blocking: keep the (double-buffered) output block under a modest
    # VMEM budget so the kernel also fits v7x (64 MiB VMEM) at production C/H/W.
    bytes_per_elem = jnp.dtype(x.dtype).itemsize
    budget_bytes = 4 << 20
    max_c = max(1, budget_bytes // max(1, H_out * W_out * bytes_per_elem))
    c_block = 1
    for d in range(1, C + 1):
        if C % d == 0 and d <= max_c:
            c_block = d
    grid = (N, C // c_block)

    kernel = functools.partial(
        _same_pad_kernel,
        pad_top=p_top, pad_bottom=p_bot, pad_left=p_left, pad_right=p_right)

    return pl.pallas_call(
        kernel,
        out_shape=jax.ShapeDtypeStruct((N, C, H_out, W_out), x.dtype),
        grid=grid,
        in_specs=[pl.BlockSpec((None, c_block, Hc, Wc), lambda n, c: (n, c, 0, 0))],
        out_specs=pl.BlockSpec((None, c_block, H_out, W_out), lambda n, c: (n, c, 0, 0)),
        compiler_params=pltpu.CompilerParams(
            dimension_semantics=("parallel", "parallel")),
    )(x)


# --- pure JAX reference for validation ---
def _ref_same_pad_2d(x, kernel_size, stride):
    N, C, H, W = x.shape
    (p_top, p_bot), (p_left, p_right) = _same_pads(H, W, kernel_size, stride)
    # Negative pads crop (matches F.pad semantics).
    x = x[:, :, max(0, -p_top):H - max(0, -p_bot),
          max(0, -p_left):W - max(0, -p_right)]
    return jnp.pad(
        x, ((0, 0), (0, 0),
            (max(0, p_top), max(0, p_bot)),
            (max(0, p_left), max(0, p_right))))


if __name__ == "__main__":
    key = jax.random.PRNGKey(0)
    k1, k2 = jax.random.split(key)
    x_sq = jax.random.normal(k1, (2, 4, 16, 16), dtype=jnp.float32)
    x_rect = jax.random.normal(k2, (2, 4, 16, 12), dtype=jnp.float32)

    cases = [
        (x_sq, (3, 3), (1, 1)),   # classic Mask-RCNN SamePad2d(3, 1): pad 1 all around
        (x_sq, (3, 3), (2, 2)),   # asymmetric split (0 left/top, 1 right/bottom)
        (x_sq, (7, 7), (2, 2)),   # larger pads (2, 3)
        (x_sq, (2, 2), (2, 2)),   # zero padding (pure copy path)
        (x_sq, (1, 1), (2, 2)),   # negative "pad" -> crop path
        (x_rect, (3, 3), (1, 2)), # non-square input, per-axis stride
    ]

    for xin, ks, st in cases:
        out = jax.block_until_ready(same_pad_2d(xin, ks, st))
        ref = _ref_same_pad_2d(xin, ks, st)
        assert out.shape == ref.shape, (ks, st, out.shape, ref.shape)
        assert jnp.array_equal(out, ref), (
            f"mismatch for kernel={ks} stride={st}: "
            f"max abs diff {jnp.max(jnp.abs(out - ref))}")

    print("KERNEL_OK")
</pallas_src>

<mosaic_0001>
module attributes {stable_mosaic.version = 11 : i64} {
  func.func @_same_pad_kernel(%arg0: i32, %arg1: i32, %arg2: memref<1x4x16x16xf32, #tpu.memory_space<vmem>>, %arg3: memref<1x4x18x18xf32, #tpu.memory_space<vmem>>) attributes {dimension_semantics = [#tpu.dimension_semantics<parallel>, #tpu.dimension_semantics<parallel>], iteration_bounds = array<i64: 2, 1>, scalar_prefetch = 0 : i64, scratch_operands = 0 : i64, tpu.core_type = #tpu.core_type<tc>, window_params = [{transform_indices = @transform_0, window_bounds = array<i64: 1, 4, 16, 16>}, {transform_indices = @transform_1, window_bounds = array<i64: 1, 4, 18, 18>}]} {
    %cst = arith.constant 0.000000e+00 : f32
    %0 = vector.broadcast %cst : f32 to vector<4x1x18xf32>
    %c0 = arith.constant 0 : index
    %c0_0 = arith.constant 0 : index
    %c0_1 = arith.constant 0 : index
    %c0_2 = arith.constant 0 : index
    %1 = vector.load %arg3[%c0, %c0_0, %c0_1, %c0_2] : memref<1x4x18x18xf32, #tpu.memory_space<vmem>>, vector<1x4x1x18xf32>
    %2 = vector.shape_cast %1 : vector<1x4x1x18xf32> to vector<4x1x18xf32>
    %3 = vector.shape_cast %0 : vector<4x1x18xf32> to vector<1x4x1x18xf32>
    tpu.vector_store %arg3[%c0, %c0_0, %c0_1, %c0_2], %3 {strides = array<i32>} : memref<1x4x18x18xf32, #tpu.memory_space<vmem>>, vector<1x4x1x18xf32>,
    %cst_3 = arith.constant 0.000000e+00 : f32
    %4 = vector.broadcast %cst_3 : f32 to vector<4x1x18xf32>
    %c0_4 = arith.constant 0 : index
    %c0_5 = arith.constant 0 : index
    %c17 = arith.constant 17 : index
    %c0_6 = arith.constant 0 : index
    %5 = vector.load %arg3[%c0_4, %c0_5, %c17, %c0_6] : memref<1x4x18x18xf32, #tpu.memory_space<vmem>>, vector<1x4x1x18xf32>
    %6 = vector.shape_cast %5 : vector<1x4x1x18xf32> to vector<4x1x18xf32>
    %7 = vector.shape_cast %4 : vector<4x1x18xf32> to vector<1x4x1x18xf32>
    tpu.vector_store %arg3[%c0_4, %c0_5, %c17, %c0_6], %7 {strides = array<i32>} : memref<1x4x18x18xf32, #tpu.memory_space<vmem>>, vector<1x4x1x18xf32>,
    %cst_7 = arith.constant 0.000000e+00 : f32
    %8 = vector.broadcast %cst_7 : f32 to vector<4x16x1xf32>
    %c0_8 = arith.constant 0 : index
    %c0_9 = arith.constant 0 : index
    %c1 = arith.constant 1 : index
    %c0_10 = arith.constant 0 : index
    %9 = vector.load %arg3[%c0_8, %c0_9, %c1, %c0_10] : memref<1x4x18x18xf32, #tpu.memory_space<vmem>>, vector<1x4x16x1xf32>
    %10 = vector.shape_cast %9 : vector<1x4x16x1xf32> to vector<4x16x1xf32>
    %11 = vector.shape_cast %8 : vector<4x16x1xf32> to vector<1x4x16x1xf32>
    tpu.vector_store %arg3[%c0_8, %c0_9, %c1, %c0_10], %11 {strides = array<i32>} : memref<1x4x18x18xf32, #tpu.memory_space<vmem>>, vector<1x4x16x1xf32>,
    %cst_11 = arith.constant 0.000000e+00 : f32
    %12 = vector.broadcast %cst_11 : f32 to vector<4x16x1xf32>
    %c0_12 = arith.constant 0 : index
    %c0_13 = arith.constant 0 : index
    %c1_14 = arith.constant 1 : index
    %c17_15 = arith.constant 17 : index
    %13 = vector.load %arg3[%c0_12, %c0_13, %c1_14, %c17_15] : memref<1x4x18x18xf32, #tpu.memory_space<vmem>>, vector<1x4x16x1xf32>
    %14 = vector.shape_cast %13 : vector<1x4x16x1xf32> to vector<4x16x1xf32>
    %15 = vector.shape_cast %12 : vector<4x16x1xf32> to vector<1x4x16x1xf32>
    tpu.vector_store %arg3[%c0_12, %c0_13, %c1_14, %c17_15], %15 {strides = array<i32>} : memref<1x4x18x18xf32, #tpu.memory_space<vmem>>, vector<1x4x16x1xf32>,
    %c0_16 = arith.constant 0 : index
    %c0_17 = arith.constant 0 : index
    %c0_18 = arith.constant 0 : index
    %c0_19 = arith.constant 0 : index
    %16 = vector.load %arg2[%c0_16, %c0_17, %c0_18, %c0_19] : memref<1x4x16x16xf32, #tpu.memory_space<vmem>>, vector<1x4x16x16xf32>
    %17 = vector.shape_cast %16 : vector<1x4x16x16xf32> to vector<4x16x16xf32>
    %c0_20 = arith.constant 0 : index
    %c0_21 = arith.constant 0 : index
    %c1_22 = arith.constant 1 : index
    %c1_23 = arith.constant 1 : index
    %18 = vector.load %arg3[%c0_20, %c0_21, %c1_22, %c1_23] : memref<1x4x18x18xf32, #tpu.memory_space<vmem>>, vector<1x4x16x16xf32>
    %19 = vector.shape_cast %18 : vector<1x4x16x16xf32> to vector<4x16x16xf32>
    %20 = vector.shape_cast %17 : vector<4x16x16xf32> to vector<1x4x16x16xf32>
    tpu.vector_store %arg3[%c0_20, %c0_21, %c1_22, %c1_23], %20 {strides = array<i32>} : memref<1x4x18x18xf32, #tpu.memory_space<vmem>>, vector<1x4x16x16xf32>,
    return
  }
  func.func @transform_0(%arg0: i32, %arg1: i32) -> (i32, i32, i32, i32) {
    %c0_i32 = arith.constant 0 : i32
    %c0_i32_0 = arith.constant 0 : i32
    %c0_i32_1 = arith.constant 0 : i32
    return %arg0, %arg1, %c0_i32, %c0_i32_0 : i32, i32, i32, i32
  }
  func.func @transform_1(%arg0: i32, %arg1: i32) -> (i32, i32, i32, i32) {
    %c0_i32 = arith.constant 0 : i32
    %c0_i32_0 = arith.constant 0 : i32
    %c0_i32_1 = arith.constant 0 : i32
    return %arg0, %arg1, %c0_i32, %c0_i32_0 : i32, i32, i32, i32
  }
}

</mosaic_0001>

<bundles_post_ra>
// kernel: tpu_custom_call.1
= control target key start
LH: loop header
LB: loop body
LE: loop exit
PB: predicated region body
PF: predicated region fallthrough
CT: control target
= control target key end

     0   :  { %6 = vsyncpa [#allocation3], 0  ;;  %s707_s0 = inlined_call_operand.hbm [shape: f32[2,4,16,16], index: 0, kind: input, shape index: {}]   ;;  %s708_s1 = inlined_call_operand.vmem [shape: f32[2,4,18,18], index: 1, kind: output, shape index: {}]  }
   0x1   :  { %8 = vsyncpa [#allocation3 + $0x1], 0  ;;  %s515_s6 = smov 0   ;;  %s517_s7 = smov 0  }
   0x2   :  { %s519_s8 = smov 0   ;;  %s521_s9 = smov 0  }
   0x3   :  { %s523_s10 = smov 0   ;;  %s525_s11 = smov 0  }
   0x4 LB: > { %s345_s12 = sadd.s32 4294967295, %s498_s11   ;;  %s26_s13 = sadd.s32 1, %s494_s10  ;;  %s498_s11 = sphi %s525_s11, %s14_s11   ;;  %s494_s10 = sphi %s523_s10, %s716_s10   ;;  %s490_s9 = sphi %s521_s9, %s715_s9   ;;  %s486_s8 = sphi %s519_s8, %s714_s8   ;;  %s482_s7 = sphi %s517_s7, %s713_s7   ;;  %s478_s6 = sphi %s515_s6, %s712_s6  }
   0x5   : > { %p28_p0 = scmp.ge.s32.totalorder %s26_s13, 2  ;;  %s35_s14 = sadd.s32 1, %s486_s8 }
   0x6   : > { %p42_p1 = scmp.ne.s32.totalorder %s486_s8, %s482_s7  ;;  %p43_p2 = scmp.eq.s32.totalorder %s498_s11, 0 }
   0x7   : > { %s718_s13 = smov (%p28_p0, %s26_s13), 0  ;;  %p48_p4 = scmp.ne.s32.totalorder %s482_s7, %s478_s6 }
   0x8   : > { %p551_p3 = por %p43_p2, %p42_p1  ;;  %s30_s16 = ssub.s32 %s494_s10, %s718_s13 }
   0x9   : > { %p49_p5 = scmp.eq.s32.totalorder %s345_s12, 0  ;;  %p33_p6 = scmp.eq.s32.totalorder %s30_s16, 0 }
   0xa   : > { %p365_p8 = scmp.lt.s32.totalorder %s498_s11, 2  ;;  %s100_s19 = sand.u32 1, %s486_s8  }
   0xb   : > { %p558_p7 = por %p49_p5, %p48_p4  ;;  %s357_s20 = sshll.u32 %s494_s10, 10 }
   0xc   : > { %s564_s18 = scalar_select %p33_p6, %s486_s8, %s35_s14  }
   0xd   : > { %s349_s21 = sshll.u32 %s100_s19, 6  ;;  %s571_s24 = scalar_lea.hbm %s707_s0, %s357_s20 }
   0xe   : > { %s104_s25 = scalar_lea.vmem [#allocation2], %s349_s21  ;;  %p575_p9 = pnand %p365_p8, %p551_p3 }
   0xf   : > { %s114_s26 = sshll.u32 %s104_s25, 4  ;;  %s581_s28 = scalar_lea.sflag [#allocation3], %s100_s19  ;;  %s579_s26 = int_to_ptr.vmem [resolvable:$true] %s114_s26 }
  0x10   : > { %s418_s29 = scalar_lea.hbm %s571_s24, 1024  ;;  %p420_p11 = pneg %p575_p9 }
  0x11   : > { %p419_p10 = scmp.ne.s32.totalorder %s571_s24, %s418_s29  ;;  %s423_s3 = scalar_lea.hbm %s707_s0, 2048 }
  0x12   : > { %p424_p0 = scmp.lt.u32.totalorder %s571_s24, %s707_s0  ;;  %p425_p1 = scmp.lt.u32.totalorder %s423_s3, %s418_s29 }
  0x13   : > { %p421_p12 = pnand %p420_p11, %p419_p10  ;;  %p427_p3 = scmp.lt.u32.totalorder %s418_s29, %s571_s24 }
  0x14   : > { %p426_p2 = por %p425_p1, %p424_p0 }
  0x15   : > { %p422_p13 = pneg %p421_p12 }
  0x16   : > { %p428_p4 = por %p427_p3, %p426_p2 }
  0x18   : > { %p429_p5 = pnand %p428_p4, %p422_p13 }
  0x1a   : > { %432 = shalt.err (!%p429_p5)
}
  0x1b   : > { %s433_s6 = scalar_lea.vmem %s579_s26, 1024  ;;  %s500_s12 = smov [#allocation2]  }
  0x1c   : > { %p434_p6 = scmp.ne.s32.totalorder %s579_s26, %s433_s6  ;;  %s438_s14 = sshll.u32 %s500_s12, 4  ;;  %s439_s14 = int_to_ptr.vmem [resolvable:$false] %s438_s14 }
  0x1d   : > { %s440_s15 = scalar_lea.vmem %s439_s14, 2048  ;;  %p441_p12 = scmp.lt.s32.totalorder %s579_s26, %s439_s14 }
  0x1e   : > { %p436_p8 = pnand %p434_p6, %p420_p11  ;;  %p442_p0 = scmp.lt.s32.totalorder %s440_s15, %s433_s6 }
  0x20   : > { %p437_p10 = pneg %p436_p8  ;;  %p443_p1 = por %p442_p0, %p441_p12 }
  0x22   : > { %p444_p2 = pnand %p443_p1, %p437_p10 }
  0x24   : > { %447 = shalt.err (!%p444_p2)
}
  0x25   : > { %s501_s16 = smov 128   ;;  %s502_s19 = smov 8  }
  0x26   : > { %364 = dma.hbm_to_vmem [thread:$0]  (!%p575_p9), %s571_s24, 1024, %s579_s26, %s581_s28, %s501_s16, %s501_s16, %s502_s19  }
  0x27   : > { %p352_p11 = scmp.ge.s32.totalorder %s498_s11, 1  ;;  %p122_p13 = scmp.lt.s32.totalorder %s498_s11, 3 }
  0x29   : > { %p123_p3 = pnand %p352_p11, %p122_p13 }
  0x2a   : > { %s128_s20 = sand.u32 (!%p123_p3), 1, %s482_s7  }
  0x2b   : > { %126 = sbr.rel (%p123_p3) target bundleno = 183 (0xb7), region = 24  ;;  %s353_s21 = sshll.u32 (!%p123_p3), %s128_s20, 6 }
  0x2c   : > { %s129_s22 = scalar_lea.sflag (!%p123_p3), [#allocation3], %s128_s20  ;;  %s612_s23 = scalar_lea.vmem (!%p123_p3), [#allocation2], %s353_s21 }
  0x32   : > { %473 = dma.done.wait (%p558_p7), %s129_s22, 1024  }
  0x33   : > { %475 = vsyncadd (%p558_p7), %s129_s22, 4294966272  ;;  %p158_p9 = scmp.lt.s32.totalorder %s490_s9, 1  ;;  %vm168_vm0 = vcmask 139264   ;;  %vm177_vm1 = vcmask 7168   ;;  %vm186_vm2 = vcmask 146568   ;;  %v197_v0 = vld [vmem:[%s612_s23 + $0x10] sm:$0xff] }
  0x34   : > { %v195_v1 = vld [vmem:[%s612_s23] sm:$0xff]  ;;  %v503_v2 = vmov 0.0   ;;  %v198_v3 = vld [vmem:[%s612_s23 + $0x18] sm:$0xff]  ;;  %v196_v4 = vld [vmem:[%s612_s23 + $0x8] sm:$0xff]  ;;  %vm235_vm3 = vcmask 138248  }
  0x35   : > { %s720_s9 = smov (!%p158_p9, %s490_s9), 1  ;;  %v200_v5 = vld [vmem:[%s612_s23 + $0x28] sm:$0xff]  ;;  %v199_v6 = vld [vmem:[%s612_s23 + $0x20] sm:$0xff]  ;;  %v202_v7 = vld [vmem:[%s612_s23 + $0x38] sm:$0xff] }
  0x36   : > { %s358_s24 = smul.u32 96, %s720_s9  ;;  %s504_s9 = smov 1   ;;  %v201_v8 = vld [vmem:[%s612_s23 + $0x30] sm:$0xff] }
  0x37   : > { %215 = vrot.lane.b32.xlu1 %v197_v0, %s504_s9  ;;  %211 = vrot.lane.b32.xlu0 %v195_v1, %s504_s9 }
  0x38   : > { %s623_s27 = scalar_lea.vmem %s708_s1, %s358_s24 }
  0x39   : > { %169 = vst.msk [vmem:[%s623_s27] sm:$0x1] %vm168_vm0, %v503_v2  ;;  %170 = vst.msk [vmem:[%s623_s27 + $0x18] sm:$0x1] %vm168_vm0, %v503_v2 }
  0x3a   : > { %171 = vst.msk [vmem:[%s623_s27 + $0x30] sm:$0x1] %vm168_vm0, %v503_v2  ;;  %172 = vst.msk [vmem:[%s623_s27 + $0x48] sm:$0x1] %vm168_vm0, %v503_v2 }
  0x3b   : > { %173 = vst.msk [vmem:[%s623_s27 + $0x11] sm:$0x1] %vm168_vm0, %v503_v2  ;;  %174 = vst.msk [vmem:[%s623_s27 + $0x29] sm:$0x1] %vm168_vm0, %v503_v2  ;;  %217 = vrot.lane.b32.xlu1 %v198_v3, %s504_s9  ;;  %213 = vrot.lane.b32.xlu0 %v196_v4, %s504_s9 }
  0x3c   : > { %175 = vst.msk [vmem:[%s623_s27 + $0x41] sm:$0x1] %vm168_vm0, %v503_v2  ;;  %176 = vst.msk [vmem:[%s623_s27 + $0x59] sm:$0x1] %vm168_vm0, %v503_v2 }
  0x3d   : > { %180 = vst.msk [vmem:[%s623_s27 + $0x19] sm:$0xff] %vm177_vm1, %v503_v2  ;;  %178 = vst.msk [vmem:[%s623_s27 + $0x1] sm:$0xff] %vm177_vm1, %v503_v2 }
  0x3e   : > { %179 = vst.msk [vmem:[%s623_s27 + $0x9] sm:$0xff] %vm177_vm1, %v503_v2  ;;  %181 = vst.msk [vmem:[%s623_s27 + $0x21] sm:$0xff] %vm177_vm1, %v503_v2 }
  0x3f   : > { %182 = vst.msk [vmem:[%s623_s27 + $0x31] sm:$0xff] %vm177_vm1, %v503_v2  ;;  %183 = vst.msk [vmem:[%s623_s27 + $0x39] sm:$0xff] %vm177_vm1, %v503_v2  ;;  %221 = vrot.lane.b32.xlu1 %v200_v5, %s504_s9  ;;  %219 = vrot.lane.b32.xlu0 %v199_v6, %s504_s9 }
  0x40   : > { %184 = vst.msk [vmem:[%s623_s27 + $0x49] sm:$0xff] %vm177_vm1, %v503_v2  ;;  %185 = vst.msk [vmem:[%s623_s27 + $0x51] sm:$0xff] %vm177_vm1, %v503_v2 }
  0x41   : > { %189 = vst.msk [vmem:[%s623_s27 + $0x19] sm:$0xff] %vm186_vm2, %v503_v2  ;;  %187 = vst.msk [vmem:[%s623_s27 + $0x1] sm:$0xff] %vm186_vm2, %v503_v2 }
  0x42   : > { %188 = vst.msk [vmem:[%s623_s27 + $0x9] sm:$0xff] %vm186_vm2, %v503_v2  ;;  %190 = vst.msk [vmem:[%s623_s27 + $0x21] sm:$0xff] %vm186_vm2, %v503_v2 }
  0x43   : > { %191 = vst.msk [vmem:[%s623_s27 + $0x31] sm:$0xff] %vm186_vm2, %v503_v2  ;;  %192 = vst.msk [vmem:[%s623_s27 + $0x39] sm:$0xff] %vm186_vm2, %v503_v2  ;;  %225 = vrot.lane.b32.xlu1 %v202_v7, %s504_s9  ;;  %223 = vrot.lane.b32.xlu0 %v201_v8, %s504_s9 }
  0x44   : > { %193 = vst.msk [vmem:[%s623_s27 + $0x49] sm:$0xff] %vm186_vm2, %v503_v2  ;;  %194 = vst.msk [vmem:[%s623_s27 + $0x51] sm:$0xff] %vm186_vm2, %v503_v2 }
  0xa9   : > { %v216_v9 = vpop.permute.xlu1 %215  ;;  %v212_v10 = vpop.permute.xlu0 %211 }
  0xaa   : > { %238 = vst.msk [vmem:[%s623_s27 + $0x19] sm:$0xff] %vm235_vm3, %v216_v9  ;;  %236 = vst.msk [vmem:[%s623_s27 + $0x1] sm:$0xff] %vm235_vm3, %v212_v10 }
  0xad   : > { %v218_v11 = vpop.permute.xlu1 %217  ;;  %v214_v12 = vpop.permute.xlu0 %213 }
  0xae   : > { %239 = vst.msk [vmem:[%s623_s27 + $0x21] sm:$0xff] %vm235_vm3, %v218_v11  ;;  %237 = vst.msk [vmem:[%s623_s27 + $0x9] sm:$0xff] %vm235_vm3, %v214_v12 }
  0xb1   : > { %v222_v13 = vpop.permute.xlu1 %221  ;;  %v220_v14 = vpop.permute.xlu0 %219 }
  0xb2   : > { %241 = vst.msk [vmem:[%s623_s27 + $0x39] sm:$0xff] %vm235_vm3, %v222_v13  ;;  %240 = vst.msk [vmem:[%s623_s27 + $0x31] sm:$0xff] %vm235_vm3, %v220_v14 }
  0xb5   : > { %v226_v15 = vpop.permute.xlu1 %225  ;;  %v224_v16 = vpop.permute.xlu0 %223 }
  0xb6   : > { %243 = vst.msk [vmem:[%s623_s27 + $0x51] sm:$0xff] %vm235_vm3, %v226_v15  ;;  %242 = vst.msk [vmem:[%s623_s27 + $0x49] sm:$0xff] %vm235_vm3, %v224_v16 }
  0xb7 PF: > { %s14_s11 = sadd.s32 1, %s498_s11   ;;  %s712_s6 = smov %s482_s7 }
  0xb8   : > { %p11_p7 = scmp.ge.s32.totalorder %s14_s11, 4   ;;  %s713_s7 = smov %s486_s8 }
  0xb9   : > { %s714_s8 = smov %s564_s18  ;;  %s715_s9 = smov %s494_s10 }
  0xba   : > { %s716_s10 = smov %s718_s13  ;;  %13 = sbr.rel (!%p11_p7) target bundleno = 4 (0x4), region = 64 }
  0xc1   :  { %276 = vsyncpa [#allocation3], 1 }
  0xc2   :  { %278 = vsyncpa [#allocation3 + $0x1], 1 }

</bundles_post_ra>
